<compile_context>
chip_gen: v5e
topology: v5e:2x2
jax: 0.10.0
libtpu: 0.0.40
codegen_flags: <defaults>
</compile_context>

<pallas_src>
import jax
import jax.numpy as jnp
from jax.experimental import pallas as pl
from jax.experimental.pallas import tpu as pltpu


def _normalize_kernel(x_ref, scale_ref, bias_ref, o_ref):
    # x_ref / o_ref: (TR, TL) tiles.  scale_ref / bias_ref: (TR, 1) f32 columns.
    x = x_ref[...].astype(jnp.float32)
    o_ref[...] = (x * scale_ref[...] + bias_ref[...]).astype(o_ref.dtype)


_BLOCK_BYTES = 8 * 1024 * 1024  # ~8 MiB per block (4-8 MiB is the sweet spot)


def _choose_tiles(R, L, itemsize, budget=_BLOCK_BYTES):
    """Byte-budgeted (TR, TL) tiles for a (R, L) slab, honoring (8,128) rules."""
    # Lane tile: the full lane extent, or the largest multiple of 128 that still
    # leaves room for >= 32 rows inside the byte budget.
    max_lanes = max(budget // (32 * itemsize), 128)
    TL = L if L <= max_lanes else max((max_lanes // 128) * 128, 128)

    # Row tile: fill the byte budget.  Multiples of 32 keep sublane packing
    # legal for f32 / bf16 / int8; the full extent is always legal.
    rows = max(((budget // (TL * itemsize)) // 32) * 32, 32)
    TR = R if rows >= R else rows

    # Keep >= 2 grid steps along a 'parallel' axis when there is enough work:
    # v7x shards parallel axes over its 2 TensorCores, and a (1, 1) grid pins
    # everything (and all per-step overhead) on one core.
    if pl.cdiv(R, TR) * pl.cdiv(L, TL) < 2:
        if R > 32:
            TR = ((pl.cdiv(R, 2) + 31) // 32) * 32
        elif L >= 256:
            TL = max((pl.cdiv(L, 2) // 128) * 128, 128)
    return TR, TL


def normalize(x, means, sds):
    """Per-channel standardization (x - mu[c]) / sigma[c].  x: (N, C, H, W)."""
    N, C, H, W = x.shape

    # Accept (C,), (C, 1, 1), ... -- the torch layer stores (C, 1, 1) buffers.
    means_f32 = jnp.asarray(means, dtype=jnp.float32).reshape(-1)
    sds_f32 = jnp.asarray(sds, dtype=jnp.float32).reshape(-1)
    assert means_f32.shape == (C,) and sds_f32.shape == (C,), (
        "means/sds must provide exactly one value per channel")

    # Never cast the normalized result back to an integer image dtype.
    out_dtype = x.dtype if jnp.issubdtype(x.dtype, jnp.floating) else jnp.float32

    # scale = 1/sigma, bias = -mu/sigma  ->  o = x*scale + bias (single FMA;
    # differs from (x - mu)/sigma by at most ~1 ulp of extra rounding).
    inv_sd = 1.0 / sds_f32
    scale_c = inv_sd
    bias_c = -means_f32 * inv_sd

    if W % 128 == 0 and H % 8 == 0:
        # Layout-free flatten: the last (lane) dim stays W, so no relayout
        # copies are inserted around the pallas_call.
        R, L = N * C * H, W
        scale_rows = jnp.tile(jnp.repeat(scale_c, H), N)
        bias_rows = jnp.tile(jnp.repeat(bias_c, H), N)
    else:
        # Lane-dense fallback: merge the spatial dims so lanes = H*W.
        R, L = N * C, H * W
        scale_rows = jnp.tile(scale_c, N)
        bias_rows = jnp.tile(bias_c, N)

    x2 = x.reshape(R, L)
    scale_col = scale_rows.reshape(R, 1)
    bias_col = bias_rows.reshape(R, 1)

    itemsize = max(jnp.dtype(x.dtype).itemsize, jnp.dtype(out_dtype).itemsize)
    TR, TL = _choose_tiles(R, L, itemsize)
    # Lane axis (j) is innermost: scale/bias blocks are constant across inner
    # steps (no redundant column DMAs) and x/out DMAs are contiguous in HBM.
    grid = (pl.cdiv(R, TR), pl.cdiv(L, TL))

    out2 = pl.pallas_call(
        _normalize_kernel,
        out_shape=jax.ShapeDtypeStruct((R, L), out_dtype),
        grid=grid,
        in_specs=[
            pl.BlockSpec((TR, TL), lambda i, j: (i, j)),   # x tile
            pl.BlockSpec((TR, 1), lambda i, j: (i, 0)),    # scale column
            pl.BlockSpec((TR, 1), lambda i, j: (i, 0)),    # bias column
        ],
        out_specs=pl.BlockSpec((TR, TL), lambda i, j: (i, j)),
        compiler_params=pltpu.CompilerParams(
            dimension_semantics=("parallel", "parallel"),
            vmem_limit_bytes=48 * 1024 * 1024,
        ),
    )(x2, scale_col, bias_col)

    return out2.reshape(N, C, H, W)


if __name__ == "__main__":
    key = jax.random.PRNGKey(0)

    N, C, H, W = 2, 4, 16, 16
    x = jax.random.normal(key, (N, C, H, W), dtype=jnp.float32)

    # Deterministic "dataset" statistics, passed in the torch buffer shape
    # (C, 1, 1) to exercise the wrapper's shape handling.
    means = jnp.array([0.485, 0.456, 0.406, 0.5], dtype=jnp.float32)
    sds = jnp.array([0.229, 0.224, 0.225, 0.25], dtype=jnp.float32)

    out = normalize(x, means.reshape(-1, 1, 1), sds.reshape(-1, 1, 1))
    out = jax.block_until_ready(out)

    # Reference in plain JAX (mirrors the PyTorch broadcasting semantics).
    ref = (x - means[None, :, None, None]) / sds[None, :, None, None]
    assert out.dtype == ref.dtype
    assert jnp.allclose(out, ref, atol=1e-5, rtol=1e-5), "mismatch vs reference"

    print("KERNEL_OK")
</pallas_src>

<mosaic_0001>
module attributes {stable_mosaic.version = 11 : i64} {
  func.func @_normalize_kernel(%arg0: i32, %arg1: i32, %arg2: memref<8x128xf32, #tpu.memory_space<vmem>>, %arg3: memref<8x1xf32, #tpu.memory_space<vmem>>, %arg4: memref<8x1xf32, #tpu.memory_space<vmem>>, %arg5: memref<8x128xf32, #tpu.memory_space<vmem>>) attributes {dimension_semantics = [#tpu.dimension_semantics<parallel>, #tpu.dimension_semantics<parallel>], iteration_bounds = array<i64: 1, 2>, scalar_prefetch = 0 : i64, scratch_operands = 0 : i64, tpu.core_type = #tpu.core_type<tc>, window_params = [{transform_indices = @transform_0, window_bounds = array<i64: 8, 128>}, {transform_indices = @transform_1, window_bounds = array<i64: 8, 1>}, {transform_indices = @transform_2, window_bounds = array<i64: 8, 1>}, {transform_indices = @transform_3, window_bounds = array<i64: 8, 128>}]} {
    %c0 = arith.constant 0 : index
    %c0_0 = arith.constant 0 : index
    %0 = vector.load %arg2[%c0, %c0_0] : memref<8x128xf32, #tpu.memory_space<vmem>>, vector<8x128xf32>
    %c0_1 = arith.constant 0 : index
    %c0_2 = arith.constant 0 : index
    %1 = vector.load %arg3[%c0_1, %c0_2] : memref<8x1xf32, #tpu.memory_space<vmem>>, vector<8x1xf32>
    %2 = vector.broadcast %1 : vector<8x1xf32> to vector<8x128xf32>
    %3 = arith.mulf %0, %2 : vector<8x128xf32>
    %c0_3 = arith.constant 0 : index
    %c0_4 = arith.constant 0 : index
    %4 = vector.load %arg4[%c0_3, %c0_4] : memref<8x1xf32, #tpu.memory_space<vmem>>, vector<8x1xf32>
    %5 = vector.broadcast %4 : vector<8x1xf32> to vector<8x128xf32>
    %6 = arith.addf %3, %5 : vector<8x128xf32>
    %c0_5 = arith.constant 0 : index
    %c0_6 = arith.constant 0 : index
    %7 = vector.load %arg5[%c0_5, %c0_6] : memref<8x128xf32, #tpu.memory_space<vmem>>, vector<8x128xf32>
    tpu.vector_store %arg5[%c0_5, %c0_6], %6 {strides = array<i32>} : memref<8x128xf32, #tpu.memory_space<vmem>>, vector<8x128xf32>,
    return
  }
  func.func @transform_0(%arg0: i32, %arg1: i32) -> (i32, i32) {
    %c0_i32 = arith.constant 0 : i32
    return %arg0, %arg1 : i32, i32
  }
  func.func @transform_1(%arg0: i32, %arg1: i32) -> (i32, i32) {
    %c0_i32 = arith.constant 0 : i32
    %c0_i32_0 = arith.constant 0 : i32
    return %arg0, %c0_i32 : i32, i32
  }
  func.func @transform_2(%arg0: i32, %arg1: i32) -> (i32, i32) {
    %c0_i32 = arith.constant 0 : i32
    %c0_i32_0 = arith.constant 0 : i32
    return %arg0, %c0_i32 : i32, i32
  }
  func.func @transform_3(%arg0: i32, %arg1: i32) -> (i32, i32) {
    %c0_i32 = arith.constant 0 : i32
    return %arg0, %arg1 : i32, i32
  }
}

</mosaic_0001>

<bundles_post_ra>
// kernel: tpu_custom_call.1
= control target key start
LH: loop header
LB: loop body
LE: loop exit
PB: predicated region body
PF: predicated region fallthrough
CT: control target
= control target key end

     0   :  { %8 = vsyncpa [#allocation3], 0  ;;  %s641_s0 = inlined_call_operand.vmem [shape: f32[8,256], index: 0, kind: input, shape index: {}]   ;;  %s642_s1 = inlined_call_operand.vmem [shape: f32[8,1], index: 1, kind: input, shape index: {}]   ;;  %s643_s2 = inlined_call_operand.vmem [shape: f32[8,1], index: 2, kind: input, shape index: {}]   ;;  %s644_s3 = inlined_call_operand.hbm [shape: f32[8,256], index: 3, kind: output, shape index: {}]  }
   0x1   :  { %10 = vsyncpa [#allocation3 + $0x1], 0  ;;  %s538_s12 = smov 0   ;;  %s540_s13 = smov 0  }
   0x2   :  { %s542_s14 = smov 0   ;;  %s544_s15 = smov 0  }
   0x3   :  { %s546_s16 = smov 0   ;;  %s548_s17 = smov 0  }
   0x4 LB: > { %s367_s18 = sadd.s32 4294967295, %s515_s17   ;;  %s368_s19 = sadd.s32 4294967294, %s515_s17   ;;  %s515_s17 = sphi %s548_s17, %s16_s17   ;;  %s511_s16 = sphi %s546_s16, %s651_s16   ;;  %s507_s15 = sphi %s544_s15, %s650_s15   ;;  %s503_s14 = sphi %s542_s14, %s649_s14   ;;  %s499_s13 = sphi %s540_s13, %s648_s13   ;;  %s495_s12 = sphi %s538_s12, %s647_s12  }
   0x5   : > { %s25_s20 = sadd.s32 1, %s511_s16  ;;  %s117_s21 = sadd.s32 1, %s503_s14 }
   0x6   : > { %p26_p0 = scmp.ge.s32.totalorder %s25_s20, 2  ;;  %p127_p1 = scmp.ne.s32.totalorder %s503_s14, %s499_s13 }
   0x7   : > { %p128_p2 = scmp.eq.s32.totalorder %s367_s18, 1  ;;  %p133_p3 = scmp.ne.s32.totalorder %s499_s13, %s495_s12 }
   0x8   : > { %s653_s20 = smov (%p26_p0, %s25_s20), 0  ;;  %p134_p5 = scmp.eq.s32.totalorder %s368_s19, 1 }
   0x9   : > { %p578_p4 = por %p128_p2, %p127_p1  ;;  %s113_s23 = ssub.s32 %s511_s16, %s653_s20 }
   0xa   : > { %p373_p6 = scmp.ge.s32.totalorder %s515_s17, 1  ;;  %p115_p7 = scmp.eq.s32.totalorder %s113_s23, 0 }
   0xb   : > { %p585_p8 = por %p134_p5, %p133_p3  ;;  %p177_p9 = scmp.lt.s32.totalorder %s515_s17, 3 }
   0xc   : > { %s591_s25 = scalar_select %p115_p7, %s503_s14, %s117_s21  }
   0xd   : > { %p178_p10 = pnand %p373_p6, %p177_p9 }
   0xe   : > { %p214_p11 = scmp.lt.s32.totalorder (!%p178_p10), %s507_s15, 1  ;;  %s209_s4 = sand.u32 (!%p178_p10), 1, %s499_s13  }
   0xf   : > { %181 = sbr.rel (%p178_p10) target bundleno = 150 (0x96), region = 32  ;;  %s374_s6 = sshll.u32 (!%p178_p10), %s209_s4, 3 }
  0x10   : > { %s377_s7 = sshll.u32 (!%p178_p10), %s507_s15, 3  ;;  %s211_s21 = scalar_lea.vmem (!%p178_p10), [#allocation2], %s374_s6 }
  0x11   : > { %s257_s19 = scalar_lea.hbm (!%p178_p10), %s644_s3, %s377_s7  ;;  %s259_s23 = sshll.u32 (!%p178_p10), %s211_s21, 4  ;;  %s260_s23 = int_to_ptr.vmem [resolvable:$true] %s259_s23 }
  0x12   : > { %s261_s26 = sshll.u32 (!%p178_p10), %s257_s19, 4  ;;  %s262_s26 = int_to_ptr.hbm [resolvable:$true] %s261_s26 }
  0x13   : > { %s451_s27 = sshra.s32 (!%p178_p10), %s262_s26, 4  ;;  %s452_s27 = int_to_ptr.hbm [resolvable:$true] %s451_s27 }
  0x14   : > { %v229_v0 = vld [vmem:[%s642_s1] sm:$0xff]  ;;  %v517_v1 = vmov 0   ;;  %s215_s30 = scalar_select %p214_p11, %s507_s15, 1 }
  0x15   : > { %436 = vset.pattern.permute.xlu0 %v517_v1  ;;  %v236_v2 = vld [vmem:[%s643_s2] sm:$0xff]  ;;  %s245_s15 = scalar_lea.sflag [#allocation3], %s209_s4  ;;  %s453_s28 = scalar_lea.hbm %s452_s27, 8 }
  0x16   : > { %232 = vperm.xlu0 %436, %v229_v0   ;;  %s375_s5 = sshll.u32 %s215_s30, 3  ;;  %p454_p12 = scmp.ne.s32.totalorder %s452_s27, %s453_s28 }
  0x17   : > { %s219_s10 = scalar_lea.vmem %s641_s0, %s375_s5  ;;  %s457_s5 = scalar_lea.hbm %s644_s3, 16 }
  0x18   : > { %v228_v4 = vld [vmem:[%s219_s10] sm:$0xff]  ;;  %p455_p13 = pnand %p454_p12, %p578_p4  ;;  %p458_p1 = scmp.lt.s32.totalorder %s452_s27, %s644_s3 }
  0x19   : > { %p459_p2 = scmp.lt.s32.totalorder %s457_s5, %s453_s28 }
  0x1a   : > { %p456_p0 = pneg %p455_p13 }
  0x1b   : > { %p460_p3 = por %p459_p2, %p458_p1 }
  0x1d   : > { %p461_p5 = pnand %p460_p3, %p456_p0 }
  0x1e   : > { %239 = vperm.xlu0 %436, %v236_v2  }
  0x88   : > { %v233_v3 = vpop.permute.xlu0 %232 }
  0x89   : > { %v235_v5 = vmul.f32 %v233_v3, %v228_v4 }
  0x90   : > { %v240_v6 = vpop.permute.xlu0 %239 }
  0x91   : > { %v242_v7 = vadd.f32 %v240_v6, %v235_v5 }
  0x93   : > { %243 = vst [vmem:[%s211_s21] sm:$0xff] %v242_v7 }
  0x94   : > { %464 = shalt.err (!%p461_p5)
}
  0x95   : > { %380 = dma.vmem_to_hbm [thread:$0]  (%p578_p4), %s260_s23, 128, %s262_s26, %s245_s15  }
  0x96 PF: > { %p386_p6 = scmp.ge.s32.totalorder %s515_s17, 2  ;;  %s273_s4 = sand.u32 1, %s495_s12  }
  0x97   : > { %s274_s8 = scalar_lea.sflag [#allocation3], %s273_s4 }
  0x98   : > { %p383_p7 = pnand %p386_p6, %p585_p8 }
  0x9a   : > { %p384_p9 = pneg %p383_p7 }
  0x9c   : > { %490 = dma.done.wait (%p384_p9), %s274_s8, 128  }
  0x9d   : > { %492 = vsyncadd (%p384_p9), %s274_s8, 4294967168  ;;  %s16_s17 = sadd.s32 1, %s515_s17   ;;  %s647_s12 = smov %s499_s13 }
  0x9e   : > { %p13_p10 = scmp.ge.s32.totalorder %s16_s17, 4   ;;  %s648_s13 = smov %s503_s14 }
  0x9f   : > { %s649_s14 = smov %s591_s25  ;;  %s650_s15 = smov %s511_s16 }
  0xa0   : > { %s651_s16 = smov %s653_s20  ;;  %15 = sbr.rel (!%p13_p10) target bundleno = 4 (0x4), region = 73 }
  0xa5   :  { %280 = vsyncpa [#allocation3], 1 }
  0xa6   :  { %282 = vsyncpa [#allocation3 + $0x1], 1 }

</bundles_post_ra>
